<compile_context>
chip_gen: v7x
topology: tpu7x:2x2x1
jax: 0.10.0
libtpu: 0.0.40
codegen_flags: <defaults>
</compile_context>

<pallas_src>
import math
from functools import partial

import jax
import jax.numpy as jnp
import numpy as np
from jax.experimental import pallas as pl
from jax.experimental.pallas import tpu as pltpu

# Irwin-Hall k=4 (sum of the 4 bytes of one uint32):
#   mean = 4 * 127.5, sigma = sqrt(4 * (256^2 - 1) / 12)
_SUM_MEAN = 4.0 * 127.5
_INV_SIGMA = 1.0 / math.sqrt(4.0 * (256.0 ** 2 - 1.0) / 12.0)

_M1 = np.uint32(0x85EBCA6B)   # murmur3 fmix32 constants (fallback path only)
_M2 = np.uint32(0xC2B2AE35)
_GOLDEN = np.uint32(0x9E3779B9)


def _fmix32(h):
    """murmur3 32-bit finalizer (uint32, wrap-around arithmetic)."""
    h = h ^ (h >> 16)
    h = h * _M1
    h = h ^ (h >> 13)
    h = h * _M2
    h = h ^ (h >> 16)
    return h


def _swar_byte_sum(h):
    """Sum of the four bytes of each uint32 word (SWAR pairwise fold)."""
    t = (h & np.uint32(0x00FF00FF)) + ((h >> 8) & np.uint32(0x00FF00FF))
    return (t & np.uint32(0x0000FFFF)) + (t >> 16)


def _noise_kernel(seed_ref, x_ref, a_ref, b_ref, o_ref, *, use_hw_prng):
    """out = x + a * s + b  with  s = byte-sum of random uint32  (~ x + std*N(0,1)).

    seed_ref : scalar-prefetch int32[1] in SMEM
    x_ref    : (TB, TL) VMEM tile
    a_ref    : (1, TL)  pre-scaled std  (std * inv_sigma)
    b_ref    : (1, TL)  bias            (-sum_mean * std * inv_sigma)
    """
    shape = x_ref.shape

    if use_hw_prng:
        # Hardware PRNG: one per-block stream keyed on (seed, block indices).
        pltpu.prng_seed(seed_ref[0], pl.program_id(0), pl.program_id(1))
        # Round the sublane dim up to 8 for robust lowering of tiny clamped blocks.
        gr = shape[0] if shape[0] % 8 == 0 else ((shape[0] + 7) // 8) * 8
        bits = pltpu.prng_random_bits((gr, shape[1]))
        if bits.dtype != jnp.uint32:
            bits = pltpu.bitcast(bits, jnp.uint32)
        if gr != shape[0]:
            bits = bits[: shape[0], :]
    else:
        # Counter-based fmix32 fallback (non-TPU backends / interpret mode).
        blk = pl.program_id(0) * pl.num_programs(1) + pl.program_id(1)
        stream = _fmix32(seed_ref[0].astype(jnp.uint32) * _GOLDEN
                         + blk.astype(jnp.uint32))
        row = jax.lax.broadcasted_iota(jnp.int32, shape, 0)
        col = jax.lax.broadcasted_iota(jnp.int32, shape, 1)
        local = (row * shape[1] + col).astype(jnp.uint32)
        bits = _fmix32(local + stream)

    s = _swar_byte_sum(bits).astype(jnp.int32).astype(jnp.float32)

    o_ref[...] = (x_ref[...].astype(jnp.float32)
                  + a_ref[...].astype(jnp.float32) * s
                  + b_ref[...].astype(jnp.float32)).astype(o_ref.dtype)


def channel_wise_noise3(x, std, seed, *, training=True, use_hw_prng=None,
                        min_pallas_bytes=256 * 1024):
    """Pallas implementation of ChannelWiseNoise3.forward.

    x:    [B, D] latent
    std:  [1, D] (or [D]) per-channel std (0.01 per the module's __init__)
    seed: python int or int32 scalar controlling the noise draw
    """
    if not training:
        return x  # eval mode: exact identity, no kernel needed

    B, D = x.shape
    std = jnp.asarray(std, dtype=jnp.float32).reshape(1, D)
    itemsize = int(np.dtype(x.dtype).itemsize)

    # ---- small-input bypass: fused XLA elementwise beats pallas fixed cost ----
    if min_pallas_bytes > 0 and B * D * itemsize < min_pallas_bytes:
        key = jax.random.PRNGKey(seed)
        return (x.astype(jnp.float32)
                + std * jax.random.normal(key, (B, D), dtype=jnp.float32)).astype(x.dtype)

    if use_hw_prng is None:
        use_hw_prng = jax.devices()[0].platform == "tpu"

    # ---- lane-dense layout ----
    folded = False
    pad = 0
    if D % 128 == 0:
        rows, lane = B, D
        xv, stdv = x, std
    elif (128 % D == 0) and ((B * D) % 128 == 0):
        # Fold (B, D) -> (B*D/128, 128): free row-major reshape, column c <-> channel c % D.
        lane = 128
        rows = (B * D) // lane
        xv = x.reshape(rows, lane)
        stdv = jnp.tile(std, (1, lane // D))
        folded = True
    else:
        # Pad channel axis to the next multiple of 128 (zero std in the pad region).
        Dp = ((D + 127) // 128) * 128
        pad = Dp - D
        xv = jnp.pad(x, ((0, 0), (0, pad)))
        stdv = jnp.pad(std, ((0, 0), (0, pad)))
        rows, lane = B, Dp

    # Pre-scaled std and bias (O(D) wrapper work, saves per-element VALU ops).
    a = stdv * jnp.float32(_INV_SIGMA)
    b = -jnp.float32(_SUM_MEAN) * a

    # ---- tiling: ~4 MiB blocks, lane axis tiled too when D is very wide ----
    target_bytes = 4 * 1024 * 1024
    if lane * 8 * itemsize > target_bytes:
        tl = max(128, ((target_bytes // (8 * itemsize)) // 128) * 128)
        tb = 8
    else:
        tl = lane
        tb = max(8, target_bytes // (lane * itemsize))
        tb = (tb // 8) * 8
    if tb >= rows:
        tb = rows                       # single full-extent row block (always legal)
    grid = (pl.cdiv(rows, tb), pl.cdiv(lane, tl))

    seed_arr = jnp.asarray(seed, dtype=jnp.int32).reshape((1,))
    kernel = partial(_noise_kernel, use_hw_prng=use_hw_prng)

    out = pl.pallas_call(
        kernel,
        out_shape=jax.ShapeDtypeStruct((rows, lane), xv.dtype),
        grid_spec=pltpu.PrefetchScalarGridSpec(
            num_scalar_prefetch=1,
            grid=grid,
            in_specs=[
                pl.BlockSpec((tb, tl), lambda i, j, _s: (i, j)),   # x tile
                pl.BlockSpec((1, tl), lambda i, j, _s: (0, j)),    # pre-scaled std
                pl.BlockSpec((1, tl), lambda i, j, _s: (0, j)),    # bias
            ],
            out_specs=pl.BlockSpec((tb, tl), lambda i, j, _s: (i, j)),
        ),
        compiler_params=pltpu.CompilerParams(
            dimension_semantics=("parallel", "parallel"),   # megacore sharding
            vmem_limit_bytes=40 * 1024 * 1024,              # 4 MiB tiles safe on all gens
        ),
        cost_estimate=pl.CostEstimate(
            flops=16 * rows * lane,
            transcendentals=0,
            bytes_accessed=2 * rows * lane * itemsize + 2 * lane * 4,
        ),
    )(seed_arr, xv, a, b)

    if folded:
        return out.reshape(B, D)
    if pad:
        return out[:, :D]
    return out


if __name__ == "__main__":
    # Deterministic parameter init per __init__: std = ones(1, d) * 0.01
    B, D = 32, 32
    std = jnp.ones((1, D), dtype=jnp.float32) * 0.01

    key = jax.random.PRNGKey(0)
    x = jax.random.normal(key, (B, D), dtype=jnp.float32)

    # Force the Pallas path (the size-based XLA bypass would otherwise win at this size).
    out = jax.block_until_ready(
        channel_wise_noise3(x, std, seed=1234, training=True, min_pallas_bytes=0))
    assert out.shape == x.shape and out.dtype == x.dtype

    noise = out - x
    max_abs = float(jnp.max(jnp.abs(noise)))
    assert max_abs < 0.1            # std=0.01 noise stays tiny
    assert max_abs > 0.0            # training mode actually perturbs the input

    emp_std = float(jnp.std(noise))
    emp_mean = float(jnp.mean(noise))
    assert 0.005 < emp_std < 0.02   # empirical std ~0.01
    assert abs(emp_mean) < 0.003    # ~zero-mean noise

    # Eval mode is exact identity.
    out_eval = jax.block_until_ready(channel_wise_noise3(x, std, seed=1234, training=False))
    assert bool(jnp.all(out_eval == x))

    print("KERNEL_OK")
</pallas_src>

<mosaic_0001>
module attributes {stable_mosaic.version = 11 : i64} {
  func.func @_noise_kernel(%arg0: i32, %arg1: i32, %arg2: memref<1xi32, #tpu.memory_space<smem>>, %arg3: memref<8x128xf32, #tpu.memory_space<vmem>>, %arg4: memref<1x128xf32, #tpu.memory_space<vmem>>, %arg5: memref<1x128xf32, #tpu.memory_space<vmem>>, %arg6: memref<8x128xf32, #tpu.memory_space<vmem>>) attributes {dimension_semantics = [#tpu.dimension_semantics<parallel>, #tpu.dimension_semantics<parallel>], iteration_bounds = array<i64: 1, 1>, scalar_prefetch = 1 : i64, scratch_operands = 0 : i64, tpu.core_type = #tpu.core_type<tc>, window_params = [{transform_indices = @transform_0, window_bounds = array<i64: 8, 128>}, {transform_indices = @transform_1, window_bounds = array<i64: 1, 128>}, {transform_indices = @transform_2, window_bounds = array<i64: 1, 128>}, {transform_indices = @transform_3, window_bounds = array<i64: 8, 128>}]} {
    %c1_i32 = arith.constant 1 : i32
    %0 = arith.muli %arg0, %c1_i32 : i32
    %1 = arith.addi %0, %arg1 : i32
    %c0 = arith.constant 0 : index
    %2 = memref.load %arg2[%c0] : memref<1xi32, #tpu.memory_space<smem>>
    %c-1640531527_i32 = arith.constant -1640531527 : i32
    %3 = arith.muli %2, %c-1640531527_i32 : i32
    %4 = arith.addi %3, %1 : i32
    %c16_i32 = arith.constant 16 : i32
    %5 = arith.shrui %4, %c16_i32 : i32
    %6 = arith.xori %4, %5 : i32
    %c-2048144789_i32 = arith.constant -2048144789 : i32
    %7 = arith.muli %6, %c-2048144789_i32 : i32
    %c13_i32 = arith.constant 13 : i32
    %8 = arith.shrui %7, %c13_i32 : i32
    %9 = arith.xori %7, %8 : i32
    %c-1028477387_i32 = arith.constant -1028477387 : i32
    %10 = arith.muli %9, %c-1028477387_i32 : i32
    %c16_i32_0 = arith.constant 16 : i32
    %11 = arith.shrui %10, %c16_i32_0 : i32
    %12 = arith.xori %10, %11 : i32
    %13 = tpu.iota {dimensions = array<i32: 0>} : vector<8x128xi32>
    %14 = tpu.iota {dimensions = array<i32: 1>} : vector<8x128xi32>
    %c128_i32 = arith.constant 128 : i32
    %15 = vector.broadcast %c128_i32 : i32 to vector<8x128xi32>
    %16 = arith.muli %13, %15 : vector<8x128xi32>
    %17 = arith.addi %16, %14 : vector<8x128xi32>
    %18 = vector.broadcast %12 : i32 to vector<8x128xi32>
    %19 = arith.addi %17, %18 : vector<8x128xi32>
    %c16_i32_1 = arith.constant 16 : i32
    %20 = vector.broadcast %c16_i32_1 : i32 to vector<8x128xi32>
    %21 = arith.shrui %19, %20 : vector<8x128xi32>
    %22 = arith.xori %19, %21 : vector<8x128xi32>
    %c-2048144789_i32_2 = arith.constant -2048144789 : i32
    %23 = vector.broadcast %c-2048144789_i32_2 : i32 to vector<8x128xi32>
    %24 = arith.muli %22, %23 : vector<8x128xi32>
    %c13_i32_3 = arith.constant 13 : i32
    %25 = vector.broadcast %c13_i32_3 : i32 to vector<8x128xi32>
    %26 = arith.shrui %24, %25 : vector<8x128xi32>
    %27 = arith.xori %24, %26 : vector<8x128xi32>
    %c-1028477387_i32_4 = arith.constant -1028477387 : i32
    %28 = vector.broadcast %c-1028477387_i32_4 : i32 to vector<8x128xi32>
    %29 = arith.muli %27, %28 : vector<8x128xi32>
    %c16_i32_5 = arith.constant 16 : i32
    %30 = vector.broadcast %c16_i32_5 : i32 to vector<8x128xi32>
    %31 = arith.shrui %29, %30 : vector<8x128xi32>
    %32 = arith.xori %29, %31 : vector<8x128xi32>
    %c16711935_i32 = arith.constant 16711935 : i32
    %33 = vector.broadcast %c16711935_i32 : i32 to vector<8x128xi32>
    %34 = arith.andi %32, %33 : vector<8x128xi32>
    %c8_i32 = arith.constant 8 : i32
    %35 = vector.broadcast %c8_i32 : i32 to vector<8x128xi32>
    %36 = arith.shrui %32, %35 : vector<8x128xi32>
    %c16711935_i32_6 = arith.constant 16711935 : i32
    %37 = vector.broadcast %c16711935_i32_6 : i32 to vector<8x128xi32>
    %38 = arith.andi %36, %37 : vector<8x128xi32>
    %39 = arith.addi %34, %38 : vector<8x128xi32>
    %c65535_i32 = arith.constant 65535 : i32
    %40 = vector.broadcast %c65535_i32 : i32 to vector<8x128xi32>
    %41 = arith.andi %39, %40 : vector<8x128xi32>
    %c16_i32_7 = arith.constant 16 : i32
    %42 = vector.broadcast %c16_i32_7 : i32 to vector<8x128xi32>
    %43 = arith.shrui %39, %42 : vector<8x128xi32>
    %44 = arith.addi %41, %43 : vector<8x128xi32>
    %45 = arith.sitofp %44 : vector<8x128xi32> to vector<8x128xf32>
    %c0_8 = arith.constant 0 : index
    %c0_9 = arith.constant 0 : index
    %46 = vector.load %arg3[%c0_8, %c0_9] : memref<8x128xf32, #tpu.memory_space<vmem>>, vector<8x128xf32>
    %c0_10 = arith.constant 0 : index
    %c0_11 = arith.constant 0 : index
    %47 = vector.load %arg4[%c0_10, %c0_11] : memref<1x128xf32, #tpu.memory_space<vmem>>, vector<1x128xf32>
    %48 = vector.broadcast %47 : vector<1x128xf32> to vector<8x128xf32>
    %49 = arith.mulf %48, %45 : vector<8x128xf32>
    %50 = arith.addf %46, %49 : vector<8x128xf32>
    %c0_12 = arith.constant 0 : index
    %c0_13 = arith.constant 0 : index
    %51 = vector.load %arg5[%c0_12, %c0_13] : memref<1x128xf32, #tpu.memory_space<vmem>>, vector<1x128xf32>
    %52 = vector.broadcast %51 : vector<1x128xf32> to vector<8x128xf32>
    %53 = arith.addf %50, %52 : vector<8x128xf32>
    %c0_14 = arith.constant 0 : index
    %c0_15 = arith.constant 0 : index
    %54 = vector.load %arg6[%c0_14, %c0_15] : memref<8x128xf32, #tpu.memory_space<vmem>>, vector<8x128xf32>
    tpu.vector_store %arg6[%c0_14, %c0_15], %53 {strides = array<i32>} : memref<8x128xf32, #tpu.memory_space<vmem>>, vector<8x128xf32>,
    return
  }
  func.func @transform_0(%arg0: i32, %arg1: i32, %arg2: memref<1xi32, #tpu.memory_space<smem>>) -> (i32, i32) {
    %c0_i32 = arith.constant 0 : i32
    return %arg0, %arg1 : i32, i32
  }
  func.func @transform_1(%arg0: i32, %arg1: i32, %arg2: memref<1xi32, #tpu.memory_space<smem>>) -> (i32, i32) {
    %c0_i32 = arith.constant 0 : i32
    %c0_i32_0 = arith.constant 0 : i32
    return %c0_i32, %arg1 : i32, i32
  }
  func.func @transform_2(%arg0: i32, %arg1: i32, %arg2: memref<1xi32, #tpu.memory_space<smem>>) -> (i32, i32) {
    %c0_i32 = arith.constant 0 : i32
    %c0_i32_0 = arith.constant 0 : i32
    return %c0_i32, %arg1 : i32, i32
  }
  func.func @transform_3(%arg0: i32, %arg1: i32, %arg2: memref<1xi32, #tpu.memory_space<smem>>) -> (i32, i32) {
    %c0_i32 = arith.constant 0 : i32
    return %arg0, %arg1 : i32, i32
  }
}

</mosaic_0001>

<bundles_post_ra>
// kernel: tpu_custom_call.1
= control target key start
LH: loop header
LB: loop body
LE: loop exit
PB: predicated region body
PF: predicated region fallthrough
CT: control target
= control target key end

     0   :  { %10 = vsyncpa [#allocation5], 0  ;;  %s211_s0 = inlined_call_operand.<no memory space> [shape: s32[1], index: 0, kind: input, shape index: {}]   ;;  %s212_s1 = inlined_call_operand.hbm [shape: f32[8,128], index: 1, kind: input, shape index: {}]   ;;  %s213_s2 = inlined_call_operand.vmem [shape: f32[1,128], index: 2, kind: input, shape index: {}]   ;;  %s214_s3 = inlined_call_operand.vmem [shape: f32[1,128], index: 3, kind: input, shape index: {}]   ;;  %s215_s4 = inlined_call_operand.hbm [shape: f32[8,128], index: 4, kind: output, shape index: {}]  }
   0x1   :  { %11 = vsyncpa [#allocation6], 0  ;;  %s151_s15 = smov [#allocation4]   ;;  %s103_s19 = scalar_lea.hbm %s212_s1, 128 }
   0x2   :  { %s18_s16 = sshll.u32 %s151_s15, 4  ;;  %p104_p0 = scmp.ne.s32.totalorder %s212_s1, %s103_s19  ;;  %s19_s16 = int_to_ptr.vmem [resolvable:$true] %s18_s16 }
   0x3   :  { %p107_p1 = scmp.lt.u32.totalorder %s103_s19, %s212_s1 }
   0x5   :  { %p109_p2 = pnand %p107_p1, %p104_p0 }
   0x7   :  { %112 = shalt.err (!%p109_p2)
}
   0x8   :  { %s113_s24 = scalar_lea.vmem %s19_s16, 128  ;;  %p118_p4 = scmp.lt.s32.totalorder %s19_s16, %s19_s16 }
   0x9   :  { %p114_p3 = scmp.ne.s32.totalorder %s19_s16, %s113_s24  ;;  %p119_p5 = scmp.lt.s32.totalorder %s113_s24, %s113_s24 }
   0xb   :  { %p120_p6 = por %p119_p5, %p118_p4 }
   0xd   :  { %p121_p7 = pnand %p120_p6, %p114_p3 }
   0xf   :  { %124 = shalt.err (!%p121_p7)
}
  0x10   :  { %21 = dma.hbm_to_vmem [thread:$0]  %s212_s1, 128, %s19_s16, [#allocation5]  }
  0x11   :  { %147 = dma.done.wait [#allocation5], 128  }
  0x12   :  { %148 = vsyncadd [#allocation5], 4294967168  ;;  %s31_s29 = smul.u32 2654435769, %s211_s0  ;;  %v41_v0 = vlaneseq  ;;  %v99_v22 = vld [vmem:[%s213_s2] ss:$0 sm:$0xff] }
  0x13   :  { %v65_v24 = vld [vmem:[#allocation4] sm:$0xff]  ;;  %s152_s14 = smov [#allocation7]  }
  0x14   :  { %s33_s30 = sshrl.u32 %s31_s29, 16  ;;  %v42_v1 = vshrl.u32 %v41_v0, 7  ;;  %v44_v2 = vand.u32 127, %v41_v0  ;;  %v100_v26 = vld [vmem:[%s214_s3] ss:$0 sm:$0xff]  ;;  %s90_s15 = sshll.u32 %s152_s14, 4  ;;  %s91_s15 = int_to_ptr.vmem [resolvable:$true] %s90_s15 }
  0x15   :  { %s34_s5 = sxor.u32 %s33_s30, %s31_s29  ;;  %s125_s16 = scalar_lea.vmem %s91_s15, 128 }
  0x16   :  { %s35_s6 = smul.u32 2246822507, %s34_s5  ;;  %v45_v3 = vmul.u32 128, %v42_v1  ;;  %p126_p8 = scmp.ne.s32.totalorder %s91_s15, %s125_s16 }
  0x17   :  { %p130_p9 = scmp.lt.s32.totalorder %s91_s15, %s91_s15  ;;  %p131_p10 = scmp.lt.s32.totalorder %s125_s16, %s125_s16 }
  0x18   :  { %s36_s7 = sshrl.u32 %s35_s6, 13  ;;  %v46_v4 = vadd.s32 %v45_v3, %v44_v2 }
  0x19   :  { %s37_s8 = sxor.u32 %s36_s7, %s35_s6  ;;  %p132_p11 = por %p131_p10, %p130_p9 }
  0x1a   :  { %s38_s9 = smul.u32 3266489909, %s37_s8 }
  0x1b   :  { %p133_p12 = pnand %p132_p11, %p126_p8 }
  0x1c   :  { %s39_s10 = sshrl.u32 %s38_s9, 16 }
  0x1d   :  { %s40_s11 = sxor.u32 %s39_s10, %s38_s9 }
  0x1e   :  { %v47_v5 = vstv %s40_s11 }
  0x1f   :  { %v48_v6 = vadd.s32 %v47_v5, %v46_v4 }
  0x21   :  { %v49_v7 = vshrl.u32 %v48_v6, 16 }
  0x23   :  { %v50_v8 = vxor.u32 %v49_v7, %v48_v6 }
  0x25   :  { %v51_v9 = vmul.u32 2246822507, %v50_v8 }
  0x27   :  { %v52_v10 = vshrl.u32 %v51_v9, 13 }
  0x29   :  { %v53_v11 = vxor.u32 %v52_v10, %v51_v9 }
  0x2b   :  { %v54_v12 = vmul.u32 3266489909, %v53_v11 }
  0x2d   :  { %v55_v13 = vshrl.u32 %v54_v12, 16 }
  0x2f   :  { %v56_v14 = vxor.u32 %v55_v13, %v54_v12 }
  0x31   :  { %v57_v15 = vand.u32 16711935, %v56_v14  ;;  %v58_v16 = vshrl.u32 %v56_v14, 8 }
  0x33   :  { %v59_v17 = vand.u32 16711935, %v58_v16 }
  0x35   :  { %v60_v18 = vadd.s32 %v59_v17, %v57_v15 }
  0x37   :  { %v61_v19 = vand.u32 65535, %v60_v18  ;;  %v62_v20 = vshrl.u32 %v60_v18, 16 }
  0x39   :  { %v63_v21 = vadd.s32 %v62_v20, %v61_v19 }
  0x3b   :  { %v64_v23 = vcvt.s32.f32 %v63_v21 }
  0x3d   :  { %v73_v25 = vmul.f32 %v99_v22, %v64_v23 }
  0x3f   :  { %v74_v27 = vadd.f32 %v73_v25, %v65_v24 }
  0x41   :  { %v82_v28 = vadd.f32 %v100_v26, %v74_v27 }
  0x43   :  { %83 = vst [vmem:[#allocation7] sm:$0xff] %v82_v28 }
  0x44   :  { %136 = shalt.err (!%p133_p12)
}
  0x45   :  { %s137_s18 = scalar_lea.hbm %s215_s4, 128 }
  0x46   :  { %p138_p13 = scmp.ne.s32.totalorder %s215_s4, %s137_s18  ;;  %p141_p0 = scmp.lt.u32.totalorder %s137_s18, %s215_s4 }
  0x48   :  { %p143_p1 = pnand %p141_p0, %p138_p13 }
  0x4a   :  { %146 = shalt.err (!%p143_p1)
}
  0x4b   :  { %93 = dma.vmem_to_hbm [thread:$0]  %s91_s15, 128, %s215_s4, [#allocation6]  }
  0x4c   :  { %149 = dma.done.wait [#allocation6], 128  }
  0x4d   :  { %150 = vsyncadd [#allocation6], 4294967168 }
  0x4e   :  { %97 = vsyncpa [#allocation5], 1 }
  0x4f   :  { %98 = vsyncpa [#allocation6], 1 }

</bundles_post_ra>
